<compile_context>
chip_gen: v7x
topology: tpu7x:2x2x1
jax: 0.10.0
libtpu: 0.0.40
codegen_flags: <defaults>
</compile_context>

<pallas_src>
import functools

import jax
import jax.numpy as jnp
from jax.experimental import pallas as pl
from jax.experimental.pallas import tpu as pltpu


# ------------------------------ fused kernel ------------------------------

def _ffn_kernel(x_ref, w1_ref, b1_ref, w2_ref, b2_ref, o_ref):
    """Fused  y = relu(x @ W1 + b1) @ W2 + b2  for one M-tile of rows.

    The hidden activation never leaves VMEM; both matmuls run on the MXU with
    float32 accumulation.  Dropout is identity (eval mode).
    """
    x = x_ref[...]
    h = jnp.dot(x, w1_ref[...], preferred_element_type=jnp.float32)
    h = jnp.maximum(h + b1_ref[...], 0.0)
    # Cast back to the weight dtype for the second MXU pass (no-op for f32,
    # keeps the bf16 path efficient if bf16 weights are supplied).
    y = jnp.dot(h.astype(w2_ref.dtype), w2_ref[...],
                preferred_element_type=jnp.float32)
    y = y + b2_ref[...]
    o_ref[...] = y.astype(o_ref.dtype)


def _pick_tile_m(m):
    """Largest row-tile <= 512 that divides M and is a multiple of 8.

    Falls back to the full extent (always a legal block shape) when M is not
    a multiple of 8.
    """
    if m % 8 != 0:
        return m
    for tm in (512, 256, 128, 64, 32, 16, 8):
        if m % tm == 0:
            return tm
    return m


def output_feed_forward(features, w1, b1, w2, b2):
    """features: (..., dim_in) -> (..., dim_out), fused MLP in one pallas_call."""
    orig_shape = features.shape
    dim_in = orig_shape[-1]
    dim_hidden = w1.shape[1]
    dim_out = w2.shape[1]

    x = features.reshape(-1, dim_in)
    m = x.shape[0]
    tm = _pick_tile_m(m)
    grid = (m // tm,)

    out = pl.pallas_call(
        _ffn_kernel,
        out_shape=jax.ShapeDtypeStruct((m, dim_out), features.dtype),
        grid=grid,
        in_specs=[
            pl.BlockSpec((tm, dim_in), lambda i: (i, 0)),        # x tile
            pl.BlockSpec((dim_in, dim_hidden), lambda i: (0, 0)),  # W1 (resident)
            pl.BlockSpec((1, dim_hidden), lambda i: (0, 0)),       # b1 (resident)
            pl.BlockSpec((dim_hidden, dim_out), lambda i: (0, 0)),  # W2 (resident)
            pl.BlockSpec((1, dim_out), lambda i: (0, 0)),           # b2 (resident)
        ],
        out_specs=pl.BlockSpec((tm, dim_out), lambda i: (i, 0)),
        compiler_params=pltpu.CompilerParams(
            dimension_semantics=("parallel",)),
    )(x, w1, b1.reshape(1, dim_hidden), w2, b2.reshape(1, dim_out))

    return out.reshape(*orig_shape[:-1], dim_out)


# ---------------------------- pure-JAX reference ----------------------------

def _ref_forward(features, w1, b1, w2, b2):
    h = jnp.maximum(features @ w1 + b1, 0.0)   # Dropout = identity (eval)
    return h @ w2 + b2


# --------------------------------- main ---------------------------------

if __name__ == "__main__":
    B, L = 2, 16
    dim_in, dim_hidden, dim_out = 64, 128, 32

    key = jax.random.PRNGKey(0)
    k_x, k_w1, k_b1, k_w2, k_b2 = jax.random.split(key, 5)

    features = jax.random.normal(k_x, (B, L, dim_in), jnp.float32)
    w1 = 0.1 * jax.random.normal(k_w1, (dim_in, dim_hidden), jnp.float32)
    b1 = 0.1 * jax.random.normal(k_b1, (dim_hidden,), jnp.float32)
    w2 = 0.1 * jax.random.normal(k_w2, (dim_hidden, dim_out), jnp.float32)
    b2 = 0.1 * jax.random.normal(k_b2, (dim_out,), jnp.float32)

    fwd = jax.jit(output_feed_forward)
    out = fwd(features, w1, b1, w2, b2)
    jax.block_until_ready(out)

    ref = _ref_forward(features, w1, b1, w2, b2)
    assert out.shape == (B, L, dim_out)
    assert jnp.allclose(out, ref, rtol=1e-4, atol=1e-4)
    print("KERNEL_OK")
</pallas_src>

<mosaic_0001>
module attributes {stable_mosaic.version = 11 : i64} {
  func.func @_ffn_kernel(%arg0: i32, %arg1: memref<32x64xf32, #tpu.memory_space<vmem>>, %arg2: memref<64x128xf32, #tpu.memory_space<vmem>>, %arg3: memref<1x128xf32, #tpu.memory_space<vmem>>, %arg4: memref<128x32xf32, #tpu.memory_space<vmem>>, %arg5: memref<1x32xf32, #tpu.memory_space<vmem>>, %arg6: memref<32x32xf32, #tpu.memory_space<vmem>>) attributes {dimension_semantics = [#tpu.dimension_semantics<parallel>], iteration_bounds = array<i64: 1>, scalar_prefetch = 0 : i64, scratch_operands = 0 : i64, tpu.core_type = #tpu.core_type<tc>, window_params = [{transform_indices = @transform_0, window_bounds = array<i64: 32, 64>}, {pipeline_mode = #tpu.pipeline_mode<synchronous>, transform_indices = @transform_1, window_bounds = array<i64: 64, 128>}, {pipeline_mode = #tpu.pipeline_mode<synchronous>, transform_indices = @transform_2, window_bounds = array<i64: 1, 128>}, {pipeline_mode = #tpu.pipeline_mode<synchronous>, transform_indices = @transform_3, window_bounds = array<i64: 128, 32>}, {pipeline_mode = #tpu.pipeline_mode<synchronous>, transform_indices = @transform_4, window_bounds = array<i64: 1, 32>}, {transform_indices = @transform_5, window_bounds = array<i64: 32, 32>}]} {
    %c0 = arith.constant 0 : index
    %c0_0 = arith.constant 0 : index
    %0 = vector.load %arg1[%c0, %c0_0] : memref<32x64xf32, #tpu.memory_space<vmem>>, vector<32x64xf32>
    %c0_1 = arith.constant 0 : index
    %c0_2 = arith.constant 0 : index
    %1 = vector.load %arg2[%c0_1, %c0_2] : memref<64x128xf32, #tpu.memory_space<vmem>>, vector<64x128xf32>
    %cst = arith.constant dense<0.000000e+00> : vector<32x128xf32>
    %2 = tpu.matmul %0, %1, %cst {dimension_numbers = #tpu.dot_dimension_numbers<[1], [0], [0], [1], [0, 0, 1, 1], [], []>} : vector<32x64xf32>, vector<64x128xf32>, vector<32x128xf32> -> vector<32x128xf32>
    %c0_3 = arith.constant 0 : index
    %c0_4 = arith.constant 0 : index
    %3 = vector.load %arg3[%c0_3, %c0_4] : memref<1x128xf32, #tpu.memory_space<vmem>>, vector<1x128xf32>
    %4 = vector.broadcast %3 : vector<1x128xf32> to vector<32x128xf32>
    %5 = arith.addf %2, %4 : vector<32x128xf32>
    %cst_5 = arith.constant 0.000000e+00 : f32
    %6 = vector.broadcast %cst_5 : f32 to vector<32x128xf32>
    %7 = arith.maximumf %5, %6 : vector<32x128xf32>
    %c0_6 = arith.constant 0 : index
    %c0_7 = arith.constant 0 : index
    %8 = vector.load %arg4[%c0_6, %c0_7] : memref<128x32xf32, #tpu.memory_space<vmem>>, vector<128x32xf32>
    %cst_8 = arith.constant dense<0.000000e+00> : vector<32x32xf32>
    %9 = tpu.matmul %7, %8, %cst_8 {dimension_numbers = #tpu.dot_dimension_numbers<[1], [0], [0], [1], [0, 0, 1, 1], [], []>} : vector<32x128xf32>, vector<128x32xf32>, vector<32x32xf32> -> vector<32x32xf32>
    %c0_9 = arith.constant 0 : index
    %c0_10 = arith.constant 0 : index
    %10 = vector.load %arg5[%c0_9, %c0_10] : memref<1x32xf32, #tpu.memory_space<vmem>>, vector<1x32xf32>
    %11 = vector.broadcast %10 : vector<1x32xf32> to vector<32x32xf32>
    %12 = arith.addf %9, %11 : vector<32x32xf32>
    %c0_11 = arith.constant 0 : index
    %c0_12 = arith.constant 0 : index
    %13 = vector.load %arg6[%c0_11, %c0_12] : memref<32x32xf32, #tpu.memory_space<vmem>>, vector<32x32xf32>
    tpu.vector_store %arg6[%c0_11, %c0_12], %12 {strides = array<i32>} : memref<32x32xf32, #tpu.memory_space<vmem>>, vector<32x32xf32>,
    return
  }
  func.func @transform_0(%arg0: i32) -> (i32, i32) {
    %c0_i32 = arith.constant 0 : i32
    %c0_i32_0 = arith.constant 0 : i32
    return %arg0, %c0_i32 : i32, i32
  }
  func.func @transform_1(%arg0: i32) -> (i32, i32) {
    %c0_i32 = arith.constant 0 : i32
    %c0_i32_0 = arith.constant 0 : i32
    %c0_i32_1 = arith.constant 0 : i32
    return %c0_i32, %c0_i32_0 : i32, i32
  }
  func.func @transform_2(%arg0: i32) -> (i32, i32) {
    %c0_i32 = arith.constant 0 : i32
    %c0_i32_0 = arith.constant 0 : i32
    %c0_i32_1 = arith.constant 0 : i32
    return %c0_i32, %c0_i32_0 : i32, i32
  }
  func.func @transform_3(%arg0: i32) -> (i32, i32) {
    %c0_i32 = arith.constant 0 : i32
    %c0_i32_0 = arith.constant 0 : i32
    %c0_i32_1 = arith.constant 0 : i32
    return %c0_i32, %c0_i32_0 : i32, i32
  }
  func.func @transform_4(%arg0: i32) -> (i32, i32) {
    %c0_i32 = arith.constant 0 : i32
    %c0_i32_0 = arith.constant 0 : i32
    %c0_i32_1 = arith.constant 0 : i32
    return %c0_i32, %c0_i32_0 : i32, i32
  }
  func.func @transform_5(%arg0: i32) -> (i32, i32) {
    %c0_i32 = arith.constant 0 : i32
    %c0_i32_0 = arith.constant 0 : i32
    return %arg0, %c0_i32 : i32, i32
  }
}

</mosaic_0001>

<bundles_post_ra>
// kernel: output_feed_forward.1
= control target key start
LH: loop header
LB: loop body
LE: loop exit
PB: predicated region body
PF: predicated region fallthrough
CT: control target
= control target key end

     0   :  { %vm40_vm0 = vcmask 523264   ;;  %s583_s0 = inlined_call_operand.vmem [shape: f32[32,64], index: 0, kind: input, shape index: {}]   ;;  %s584_s1 = inlined_call_operand.vmem [shape: f32[64,128], index: 1, kind: input, shape index: {}]   ;;  %s585_s2 = inlined_call_operand.vmem [shape: f32[1,128], index: 2, kind: input, shape index: {}]   ;;  %s586_s3 = inlined_call_operand.vmem [shape: f32[128,32], index: 3, kind: input, shape index: {}]   ;;  %s587_s4 = inlined_call_operand.vmem [shape: f32[1,32], index: 4, kind: input, shape index: {}]   ;;  %s588_s5 = inlined_call_operand.hbm [shape: f32[32,32], index: 5, kind: output, shape index: {}]  }
   0x1   :  { %v25_v0 = vld [vmem:[%s584_s1] sm:$0xff]  ;;  %v26_v1 = vld [vmem:[%s584_s1 + $0x8] sm:$0xff]  ;;  %v27_v2 = vld [vmem:[%s584_s1 + $0x10] sm:$0xff] }
   0x2   :  { %v369_v3 = vpack.c.bf16 %v26_v1, %v25_v0  ;;  %v28_v4 = vld [vmem:[%s584_s1 + $0x18] sm:$0xff]  ;;  %v29_v6 = vld [vmem:[%s584_s1 + $0x20] sm:$0xff]  ;;  %v30_v7 = vld [vmem:[%s584_s1 + $0x28] sm:$0xff] }
   0x3   :  { %v373_v5 = vpack.c.bf16 %v28_v4, %v27_v2  ;;  %v21_v8 = vld [vmem:[%s583_s0] sm:$0xff]  ;;  %v143_v10 = vld [vmem:[%s586_s3 + $0x8] sm:$0xff]  ;;  %v144_v11 = vld [vmem:[%s586_s3 + $0x10] sm:$0xff]  ;;  %v377_v12 = vpack.c.bf16 %v30_v7, %v29_v6 }
   0x4   :  { %370 = vmatprep.subr.bf16.mxu0 %v369_v3  ;;  %325 = vmatprep.mubr.msk.f32.mxu0 %vm40_vm0, %v21_v8  ;;  %v142_v9 = vld [vmem:[%s586_s3] sm:$0xff]  ;;  %v31_v13 = vld [vmem:[%s584_s1 + $0x30] sm:$0xff]  ;;  %v145_v15 = vld [vmem:[%s586_s3 + $0x18] sm:$0xff] }
   0x5   :  { %372 = vmatpush3.bf16.msra.mxu0 %v369_v3  ;;  %v385_v14 = vpack.c.bf16 %v143_v10, %v142_v9  ;;  %v32_v16 = vld [vmem:[%s584_s1 + $0x38] sm:$0xff]  ;;  %v389_v17 = vpack.c.bf16 %v145_v15, %v144_v11  ;;  %v146_v18 = vld [vmem:[%s586_s3 + $0x20] sm:$0xff]  ;;  %v147_v19 = vld [vmem:[%s586_s3 + $0x28] sm:$0xff] }
   0x6   :  { %374 = vmatprep.subr.bf16.mxu0 %v373_v5 }
   0x7   :  { %386 = vmatprep.subr.bf16.mxu1 %v385_v14 }
   0x8   :  { %388 = vmatpush3.bf16.msra.mxu1 %v385_v14 }
   0x9   :  { %376 = vmatpush3.bf16.msra.mxu0 %v373_v5 }
   0xa   :  { %10 = vsyncpa [#allocation3], 0  ;;  %378 = vmatprep.subr.bf16.mxu0 %v377_v12  ;;  %v381_v20 = vpack.c.bf16 %v32_v16, %v31_v13  ;;  %390 = vmatprep.subr.bf16.mxu1 %v389_v17  ;;  %v393_v21 = vpack.c.bf16 %v147_v19, %v146_v18  ;;  %v148_v22 = vld [vmem:[%s586_s3 + $0x30] sm:$0xff]  ;;  %v149_v23 = vld [vmem:[%s586_s3 + $0x38] sm:$0xff]  ;;  %vm250_vm1 = vcmask 261120  }
   0xb   :  { %v397_v24 = vpack.c.bf16 %v149_v23, %v148_v22  ;;  %v150_v25 = vld [vmem:[%s586_s3 + $0x40] sm:$0xff]  ;;  %v151_v26 = vld [vmem:[%s586_s3 + $0x48] sm:$0xff]  ;;  %v23_v28 = vld [vmem:[%s583_s0 + $0x10] sm:$0xff] }
   0xc   :  { %392 = vmatpush3.bf16.msra.mxu1 %v389_v17  ;;  %v22_v27 = vld [vmem:[%s583_s0 + $0x8] sm:$0xff]  ;;  %v401_v29 = vpack.c.bf16 %v151_v26, %v150_v25  ;;  %v152_v30 = vld [vmem:[%s586_s3 + $0x50] sm:$0xff]  ;;  %v153_v31 = vld [vmem:[%s586_s3 + $0x58] sm:$0xff] }
   0xd   :  { %380 = vmatpush3.bf16.msra.mxu0 %v377_v12  ;;  %394 = vmatprep.subr.bf16.mxu1 %v393_v21  ;;  %v24_v32 = vld [vmem:[%s583_s0 + $0x18] sm:$0xff]  ;;  %v405_v33 = vpack.c.bf16 %v153_v31, %v152_v30  ;;  %v154_v34 = vld [vmem:[%s586_s3 + $0x60] sm:$0xff]  ;;  %v155_v35 = vld [vmem:[%s586_s3 + $0x68] sm:$0xff] }
   0xe   :  { %382 = vmatprep.subr.bf16.mxu0 %v381_v20  ;;  %v409_v36 = vpack.c.bf16 %v155_v35, %v154_v34  ;;  %v156_v37 = vld [vmem:[%s586_s3 + $0x70] sm:$0xff]  ;;  %v157_v38 = vld [vmem:[%s586_s3 + $0x78] sm:$0xff]  ;;  %v271_v40 = vld [vmem:[%s585_s2] ss:$0 sm:$0xff]  ;;  %s444_s2 = smov [#allocation2]  }
   0xf   :  { %v413_v39 = vpack.c.bf16 %v157_v38, %v156_v37  ;;  %v276_v53 = vld [vmem:[%s587_s4] ss:$0 sm:$0xff]  ;;  %s260_s1 = sshll.u32 %s444_s2, 4  ;;  %s261_s1 = int_to_ptr.vmem [resolvable:$true] %s260_s1 }
  0x10   :  { %396 = vmatpush3.bf16.msra.mxu1 %v393_v21  ;;  %s420_s25 = scalar_lea.vmem %s261_s1, 512  ;;  %p425_p1 = scmp.lt.s32.totalorder %s261_s1, %s261_s1 }
  0x11   :  { %384 = vmatpush3.bf16.msra.mxu0 %v381_v20  ;;  %398 = vmatprep.subr.bf16.mxu1 %v397_v24  ;;  %p421_p0 = scmp.ne.s32.totalorder %s261_s1, %s420_s25  ;;  %p426_p2 = scmp.lt.s32.totalorder %s420_s25, %s420_s25 }
  0x13   :  { %p427_p3 = por %p426_p2, %p425_p1 }
  0x14   :  { %326 = vmatmul.mubr.msk.f32.vlgmr.msra.gmra.mrb[0].mxu0 %vm40_vm0, %v22_v27  ;;  %400 = vmatpush3.bf16.msra.mxu1 %v397_v24 }
  0x15   :  { %328 = vmatprep.mubr.msk.f32.mxu0 %vm40_vm0, %v23_v28  ;;  %402 = vmatprep.subr.bf16.mxu1 %v401_v29  ;;  %p428_p4 = pnand %p427_p3, %p421_p0 }
  0x18   :  { %329 = vmatmul.mubr.msk.f32.gmra.mrb[2].mxu0 %vm40_vm0, %v24_v32  ;;  %404 = vmatpush3.bf16.msra.mxu1 %v401_v29 }
  0x19   :  { %406 = vmatprep.subr.bf16.mxu1 %v405_v33 }
  0x1c   :  { %408 = vmatpush3.bf16.msra.mxu1 %v405_v33 }
  0x1d   :  { %410 = vmatprep.subr.bf16.mxu1 %v409_v36 }
  0x20   :  { %412 = vmatpush3.bf16.msra.mxu1 %v409_v36 }
  0x21   :  { %414 = vmatprep.subr.bf16.mxu1 %v413_v39 }
  0x24   :  { %416 = vmatpush3.bf16.msra.mxu1 %v413_v39 }
  0xe7   :  { %v327_v41 = vpop.f32.mrb[0].mxu0 }
  0xe8   :  { %v125_v42 = vadd.f32 %v327_v41, %v271_v40  ;;  %v119_v43 = vpop.f32.mrb[1].mxu0 }
  0xe9   :  { %v120_v44 = vadd.f32 %v271_v40, %v119_v43 }
  0xea   :  { %v139_v47 = vmax.f32 %v125_v42, 0.0 }
  0xeb   :  { %v330_v45 = vpop.f32.mrb[2].mxu0  ;;  %v138_v46 = vmax.f32 %v120_v44, 0.0 }
  0xec   :  { %v135_v48 = vadd.f32 %v330_v45, %v271_v40  ;;  %v129_v49 = vpop.f32.mrb[3].mxu0 }
  0xed   :  { %v130_v50 = vadd.f32 %v271_v40, %v129_v49  ;;  %363 = vmatprep.mubr.f32.mxu1 %v138_v46 }
  0xee   :  { %364 = vmatmul.mubr.f32.vlgmr.msra.gmra.mrb[0].mxu1 %v139_v47  ;;  %v141_v52 = vmax.f32 %v135_v48, 0.0 }
  0xef   :  { %v140_v51 = vmax.f32 %v130_v50, 0.0 }
  0xf1   :  { %366 = vmatprep.mubr.f32.mxu1 %v140_v51 }
  0xf2   :  { %367 = vmatmul.mubr.f32.gmra.mrb[2].mxu1 %v141_v52 }
 0x1c1   :  { %v365_v54 = vpop.f32.mrb[0].mxu1 }
 0x1c2   :  { %v237_v55 = vadd.f32 %v365_v54, %v276_v53  ;;  %v231_v56 = vpop.f32.mrb[1].mxu1 }
 0x1c3   :  { %v232_v57 = vadd.f32 %v276_v53, %v231_v56 }
 0x1c4   :  { %252 = vst.msk [vmem:[#allocation2 + $0x8] sm:$0xff] %vm250_vm1, %v237_v55 }
 0x1c5   :  { %251 = vst.msk [vmem:[#allocation2] sm:$0xff] %vm250_vm1, %v232_v57  ;;  %v368_v58 = vpop.f32.mrb[2].mxu1 }
 0x1c6   :  { %v247_v59 = vadd.f32 %v368_v58, %v276_v53  ;;  %v241_v60 = vpop.f32.mrb[3].mxu1 }
 0x1c7   :  { %v242_v61 = vadd.f32 %v276_v53, %v241_v60 }
 0x1c8   :  { %254 = vst.msk [vmem:[#allocation2 + $0x18] sm:$0xff] %vm250_vm1, %v247_v59 }
 0x1c9   :  { %253 = vst.msk [vmem:[#allocation2 + $0x10] sm:$0xff] %vm250_vm1, %v242_v61 }
 0x1ca   :  { %431 = shalt.err (!%p428_p4)
}
 0x1cb   :  { %s432_s27 = scalar_lea.hbm %s588_s5, 512 }
 0x1cc   :  { %p433_p5 = scmp.ne.s32.totalorder %s588_s5, %s432_s27  ;;  %p436_p6 = scmp.lt.u32.totalorder %s432_s27, %s588_s5 }
 0x1ce   :  { %p438_p7 = pnand %p436_p6, %p433_p5 }
 0x1d0   :  { %441 = shalt.err (!%p438_p7)
}
 0x1d1   :  { %s445_s7 = smov 128   ;;  %s446_s8 = smov 8  }
 0x1d2   :  { %266 = dma.vmem_to_hbm [thread:$0]  %s261_s1, 512, %s588_s5, [#allocation3], %s445_s7, %s445_s7, %s446_s8  }
 0x1d3   :  { %442 = dma.done.wait [#allocation3], 512  }
 0x1d4   :  { %443 = vsyncadd [#allocation3], 4294966784 }
 0x1d5   :  { %270 = vsyncpa [#allocation3], 1 }

</bundles_post_ra>
